<compile_context>
chip_gen: v5e
topology: v5e:2x2
jax: 0.10.0
libtpu: 0.0.40
codegen_flags: <defaults>
</compile_context>

<pallas_src>
import math

import jax
import jax.numpy as jnp
from jax import lax
from jax.experimental import pallas as pl
from jax.experimental.pallas import tpu as pltpu


def _round_up(x: int, m: int) -> int:
    return ((x + m - 1) // m) * m


def _vmem_limit_bytes() -> int:
    """Generation-aware VMEM budget with headroom for compiler scratch."""
    cap = 128 * 1024 * 1024
    try:
        info_cap = pltpu.get_tpu_info().vmem_capacity_bytes
        if info_cap:
            cap = int(info_cap)
    except Exception:
        pass
    # ~62% of physical VMEM, capped at 96 MiB, floored at 32 MiB.
    return int(max(min(cap * 5 // 8, 96 * 1024 * 1024), 32 * 1024 * 1024))


def _choose_q_tile(B: int, Lq: int, L: int) -> int:
    """Pick tq jointly with L so the (tq, L) f32 intermediates stay small."""
    # Cap: one (tq, L) f32 slab <= ~6 MiB (scores/exp/attn live in this regime).
    max_tq = max(64, (6 * 1024 * 1024) // max(4 * L, 1))
    tq = None
    for t in (512, 256, 128, 64):
        if t <= max_tq and Lq % t == 0:
            tq = t
            break
    if tq is None:
        if Lq <= min(max_tq, 512):
            tq = Lq                      # small/odd Lq: one full-extent tile
        else:
            for t in (512, 256, 128, 64):  # awkward Lq: pad up in the wrapper
                if t <= max_tq:
                    tq = t
                    break
    # v7x megacore: keep at least 2 parallel grid steps so no TC idles.
    while B * math.ceil(Lq / tq) < 2 and tq > 64 and tq % 2 == 0:
        tq //= 2
    return tq


def _make_kernel(has_mask, dropout_p, training, seed, inv_sqrt_dk, n_q,
                 mm_precision, bmm2_bf16):
    apply_dropout = training and dropout_p > 0.0
    if apply_dropout:
        keep_thresh = jnp.uint32(min(int(round(dropout_p * (2 ** 32))), 2 ** 32 - 1))
        keep_scale = jnp.float32(1.0 / (1.0 - dropout_p))

    def kernel(*refs):
        if has_mask:
            q_ref, k_ref, v_ref, mask_ref, ctx_ref, attn_ref = refs
        else:
            q_ref, k_ref, v_ref, ctx_ref, attn_ref = refs

        # Blocks carry a size-1 batch dim; index it away -> clean 2-D tiles.
        # q: (tq, dk_p), k: (L, dk_p), v: (L, dv_p)
        # Fold 1/sqrt(d_k) into q (tq*dk elements instead of tq*L scores).
        q = q_ref[0] * jnp.asarray(inv_sqrt_dk, q_ref.dtype)

        # scores = q @ k^T -> (tq, L); f32 accumulation on the MXU.
        scores = lax.dot_general(
            q, k_ref[0],
            dimension_numbers=(((1,), (1,)), ((), ())),
            preferred_element_type=jnp.float32,
            precision=mm_precision,
        )

        if has_mask:
            # torch masked_fill_(mask, -inf); fully-masked rows -> NaN like torch.
            scores = jnp.where(mask_ref[0], -jnp.inf, scores)

        # Softmax over the key axis (torch Softmax(dim=2)); f32, exact division.
        # Keep the live (tq, L) slabs to a minimum by overwriting `scores`.
        scores = scores - jnp.max(scores, axis=-1, keepdims=True)
        e = jnp.exp(scores)
        attn = e / jnp.sum(e, axis=-1, keepdims=True)

        if apply_dropout:
            # Inverted dropout with the on-chip PRNG; keep-decision directly on
            # the raw uint32 bits (no u32->f32 pass).
            # TODO(synk): not bit-identical to torch.nn.Dropout's RNG stream.
            pltpu.prng_seed(seed + pl.program_id(0) * n_q + pl.program_id(1))
            bits = pltpu.bitcast(pltpu.prng_random_bits(attn.shape), jnp.uint32)
            attn = jnp.where(bits >= keep_thresh, attn * keep_scale, 0.0)

        # context = attention @ v -> (tq, dv_p); f32 accumulation.
        if bmm2_bf16:
            ctx = jnp.dot(attn.astype(jnp.bfloat16),
                          v_ref[0].astype(jnp.bfloat16),
                          preferred_element_type=jnp.float32)
        else:
            ctx = jnp.dot(attn.astype(v_ref.dtype), v_ref[0],
                          preferred_element_type=jnp.float32,
                          precision=mm_precision)

        ctx_ref[0] = ctx.astype(ctx_ref.dtype)
        attn_ref[0] = attn.astype(attn_ref.dtype)

    return kernel


def scaled_dot_product_attention(q, k, v, mask=None, *, dropout_p=0.5,
                                 training=False, seed=0, bmm2_in_bf16=False):
    """Pallas version of ScaledDotProductAttention.forward.

    q: [B, Lq, dk], k: [B, L, dk], v: [B, L, dv]; mask (optional): bool [B, Lq, L].
    Returns (context [B, Lq, dv], attention [B, Lq, L]), both in q.dtype.
    In eval mode (training=False) dropout is the identity, like torch .eval().
    """
    B, Lq, dk = q.shape
    Bk, L, dk2 = k.shape
    Bv, L2, dv = v.shape
    assert B == Bk == Bv and dk == dk2 and L == L2

    inv_sqrt_dk = 1.0 / math.sqrt(dk)          # scale uses the ORIGINAL d_k

    # f32 callers get full-precision matmuls (matches torch f32 bmm); bf16/fp8
    # callers keep the fast single-pass MXU path.
    mm_precision = (lax.Precision.HIGHEST if q.dtype == jnp.float32
                    else lax.Precision.DEFAULT)

    # Lane-dense head dims: zero-pad d_k / d_v up to multiples of 128 so the
    # ctx store is an unmasked vst and the MXU contraction is 128-aligned.
    dk_p = _round_up(dk, 128)
    dv_p = _round_up(dv, 128)
    if dk_p != dk:
        q = jnp.pad(q, ((0, 0), (0, 0), (0, dk_p - dk)))
        k = jnp.pad(k, ((0, 0), (0, 0), (0, dk_p - dk)))
    if dv_p != dv:
        v = jnp.pad(v, ((0, 0), (0, 0), (0, dv_p - dv)))

    # L-aware q tiling; awkward Lq gets padded to a multiple of the tile.
    tq = _choose_q_tile(B, Lq, L)
    Lq_p = _round_up(Lq, tq)
    if mask is not None:
        mask = mask.astype(jnp.bool_)
    if Lq_p != Lq:
        q = jnp.pad(q, ((0, 0), (0, Lq_p - Lq), (0, 0)))
        if mask is not None:
            mask = jnp.pad(mask, ((0, 0), (0, Lq_p - Lq), (0, 0)))
    n_q = Lq_p // tq

    has_mask = mask is not None
    kernel = _make_kernel(has_mask, float(dropout_p), bool(training), int(seed),
                          inv_sqrt_dk, n_q, mm_precision, bool(bmm2_in_bf16))

    in_specs = [
        pl.BlockSpec((1, tq, dk_p), lambda b, i: (b, i, 0)),
        # K/V index_maps ignore i -> DMA'd once per batch, reused across q tiles.
        pl.BlockSpec((1, L, dk_p), lambda b, i: (b, 0, 0)),
        pl.BlockSpec((1, L, dv_p), lambda b, i: (b, 0, 0)),
    ]
    inputs = [q, k, v]
    if has_mask:
        in_specs.append(pl.BlockSpec((1, tq, L), lambda b, i: (b, i, 0)))
        inputs.append(mask)

    out_specs = [
        pl.BlockSpec((1, tq, dv_p), lambda b, i: (b, i, 0)),
        pl.BlockSpec((1, tq, L), lambda b, i: (b, i, 0)),
    ]
    out_dtype = q.dtype
    out_shape = (
        jax.ShapeDtypeStruct((B, Lq_p, dv_p), out_dtype),
        jax.ShapeDtypeStruct((B, Lq_p, L), out_dtype),
    )

    ctx, attn = pl.pallas_call(
        kernel,
        out_shape=out_shape,
        grid_spec=pltpu.PrefetchScalarGridSpec(
            num_scalar_prefetch=0,
            grid=(B, n_q),
            in_specs=in_specs,
            out_specs=out_specs,
        ),
        compiler_params=pltpu.CompilerParams(
            dimension_semantics=("parallel", "parallel"),
            vmem_limit_bytes=_vmem_limit_bytes(),
        ),
    )(*inputs)

    # Strip the wrapper padding.
    if Lq_p != Lq or dv_p != dv:
        ctx = ctx[:, :Lq, :dv]
        attn = attn[:, :Lq, :]
    return ctx, attn


def _reference(q, k, v, mask=None):
    dk = q.shape[-1]
    scaled = jnp.einsum("bqd,bkd->bqk", q, k,
                        precision=lax.Precision.HIGHEST) / jnp.sqrt(jnp.float32(dk))
    if mask is not None:
        scaled = jnp.where(mask, -jnp.inf, scaled)
    attn = jax.nn.softmax(scaled, axis=2)
    ctx = jnp.einsum("bqk,bkd->bqd", attn, v, precision=lax.Precision.HIGHEST)
    return ctx, attn


if __name__ == "__main__":
    # Small shapes implied by the forward: B=2, Lq=8, L=8, d_k=32, d_v=32.
    key = jax.random.PRNGKey(0)
    kq, kk, kv, km = jax.random.split(key, 4)
    B, Lq, L, dk, dv = 2, 8, 8, 32, 32
    q = jax.random.normal(kq, (B, Lq, dk), dtype=jnp.float32)
    k = jax.random.normal(kk, (B, L, dk), dtype=jnp.float32)
    v = jax.random.normal(kv, (B, L, dv), dtype=jnp.float32)

    # Eval-mode forward (dropout == identity), no mask — deterministic.
    ctx, attn = scaled_dot_product_attention(q, k, v, mask=None, training=False)
    jax.block_until_ready((ctx, attn))
    ctx_ref, attn_ref = _reference(q, k, v)
    assert ctx.shape == (B, Lq, dv) and attn.shape == (B, Lq, L)
    assert jnp.allclose(ctx, ctx_ref, atol=1e-3, rtol=1e-3)
    assert jnp.allclose(attn, attn_ref, atol=1e-3, rtol=1e-3)

    # Masked case (no fully-masked rows, so no NaNs on either side).
    mask = jax.random.uniform(km, (B, Lq, L)) > 0.6
    mask = mask.at[:, :, 0].set(False)
    ctx_m, attn_m = scaled_dot_product_attention(q, k, v, mask=mask, training=False)
    jax.block_until_ready((ctx_m, attn_m))
    ctx_mr, attn_mr = _reference(q, k, v, mask)
    assert jnp.allclose(ctx_m, ctx_mr, atol=1e-3, rtol=1e-3)
    assert jnp.allclose(attn_m, attn_mr, atol=1e-3, rtol=1e-3)

    print("KERNEL_OK")
</pallas_src>

<mosaic_0001>
module attributes {stable_mosaic.version = 11 : i64} {
  func.func @kernel(%arg0: i32, %arg1: i32, %arg2: memref<1x8x128xf32, #tpu.memory_space<vmem>>, %arg3: memref<1x8x128xf32, #tpu.memory_space<vmem>>, %arg4: memref<1x8x128xf32, #tpu.memory_space<vmem>>, %arg5: memref<1x8x128xf32, #tpu.memory_space<vmem>>, %arg6: memref<1x8x8xf32, #tpu.memory_space<vmem>>) attributes {dimension_semantics = [#tpu.dimension_semantics<parallel>, #tpu.dimension_semantics<parallel>], iteration_bounds = array<i64: 2, 1>, scalar_prefetch = 0 : i64, scratch_operands = 0 : i64, tpu.core_type = #tpu.core_type<tc>, window_params = [{transform_indices = @transform_0, window_bounds = array<i64: 1, 8, 128>}, {transform_indices = @transform_1, window_bounds = array<i64: 1, 8, 128>}, {transform_indices = @transform_2, window_bounds = array<i64: 1, 8, 128>}, {transform_indices = @transform_3, window_bounds = array<i64: 1, 8, 128>}, {transform_indices = @transform_4, window_bounds = array<i64: 1, 8, 8>}]} {
    %c0 = arith.constant 0 : index
    %c0_0 = arith.constant 0 : index
    %c0_1 = arith.constant 0 : index
    %0 = vector.load %arg2[%c0, %c0_0, %c0_1] : memref<1x8x128xf32, #tpu.memory_space<vmem>>, vector<1x8x128xf32>
    %1 = vector.shape_cast %0 : vector<1x8x128xf32> to vector<8x128xf32>
    %cst = arith.constant 0.176776692 : f32
    %2 = vector.broadcast %cst : f32 to vector<8x128xf32>
    %3 = arith.mulf %1, %2 : vector<8x128xf32>
    %c0_2 = arith.constant 0 : index
    %c0_3 = arith.constant 0 : index
    %c0_4 = arith.constant 0 : index
    %4 = vector.load %arg3[%c0_2, %c0_3, %c0_4] : memref<1x8x128xf32, #tpu.memory_space<vmem>>, vector<1x8x128xf32>
    %5 = vector.shape_cast %4 : vector<1x8x128xf32> to vector<8x128xf32>
    %cst_5 = arith.constant dense<0.000000e+00> : vector<8x8xf32>
    %6 = tpu.matmul %3, %5, %cst_5 {dimension_numbers = #tpu.dot_dimension_numbers<[1], [1], [0], [0], [0, 0, 1, 0], [], []>, precision = #tpu.contract_precision<fp32>} : vector<8x128xf32>, vector<8x128xf32>, vector<8x8xf32> -> vector<8x8xf32>
    %cst_6 = arith.constant dense<0xFF800000> : vector<8xf32>
    %7 = vector.multi_reduction <maximumf>, %6, %cst_6 [1] : vector<8x8xf32> to vector<8xf32>
    %8 = vector.shape_cast %7 : vector<8xf32> to vector<8x1xf32>
    %9 = vector.broadcast %8 : vector<8x1xf32> to vector<8x8xf32>
    %10 = arith.subf %6, %9 : vector<8x8xf32>
    %11 = math.exp %10 : vector<8x8xf32>
    %cst_7 = arith.constant dense<0.000000e+00> : vector<8xf32>
    %12 = vector.multi_reduction <add>, %11, %cst_7 [1] : vector<8x8xf32> to vector<8xf32>
    %13 = vector.shape_cast %12 : vector<8xf32> to vector<8x1xf32>
    %14 = vector.broadcast %13 : vector<8x1xf32> to vector<8x8xf32>
    %15 = arith.divf %11, %14 : vector<8x8xf32>
    %c0_8 = arith.constant 0 : index
    %c0_9 = arith.constant 0 : index
    %c0_10 = arith.constant 0 : index
    %16 = vector.load %arg4[%c0_8, %c0_9, %c0_10] : memref<1x8x128xf32, #tpu.memory_space<vmem>>, vector<1x8x128xf32>
    %17 = vector.shape_cast %16 : vector<1x8x128xf32> to vector<8x128xf32>
    %cst_11 = arith.constant dense<0.000000e+00> : vector<8x128xf32>
    %18 = tpu.matmul %15, %17, %cst_11 {dimension_numbers = #tpu.dot_dimension_numbers<[1], [0], [0], [1], [0, 0, 1, 1], [], []>, precision = #tpu.contract_precision<fp32>} : vector<8x8xf32>, vector<8x128xf32>, vector<8x128xf32> -> vector<8x128xf32>
    %c0_12 = arith.constant 0 : index
    %c0_13 = arith.constant 0 : index
    %c0_14 = arith.constant 0 : index
    %19 = vector.load %arg5[%c0_12, %c0_13, %c0_14] : memref<1x8x128xf32, #tpu.memory_space<vmem>>, vector<1x8x128xf32>
    %20 = vector.shape_cast %19 : vector<1x8x128xf32> to vector<8x128xf32>
    %21 = vector.shape_cast %18 : vector<8x128xf32> to vector<1x8x128xf32>
    tpu.vector_store %arg5[%c0_12, %c0_13, %c0_14], %21 {strides = array<i32>} : memref<1x8x128xf32, #tpu.memory_space<vmem>>, vector<1x8x128xf32>,
    %c0_15 = arith.constant 0 : index
    %c0_16 = arith.constant 0 : index
    %c0_17 = arith.constant 0 : index
    %22 = vector.load %arg6[%c0_15, %c0_16, %c0_17] : memref<1x8x8xf32, #tpu.memory_space<vmem>>, vector<1x8x8xf32>
    %23 = vector.shape_cast %22 : vector<1x8x8xf32> to vector<8x8xf32>
    %24 = vector.shape_cast %15 : vector<8x8xf32> to vector<1x8x8xf32>
    tpu.vector_store %arg6[%c0_15, %c0_16, %c0_17], %24 {strides = array<i32>} : memref<1x8x8xf32, #tpu.memory_space<vmem>>, vector<1x8x8xf32>,
    return
  }
  func.func @transform_0(%arg0: i32, %arg1: i32) -> (i32, i32, i32) {
    %c0_i32 = arith.constant 0 : i32
    %c0_i32_0 = arith.constant 0 : i32
    return %arg0, %arg1, %c0_i32 : i32, i32, i32
  }
  func.func @transform_1(%arg0: i32, %arg1: i32) -> (i32, i32, i32) {
    %c0_i32 = arith.constant 0 : i32
    %c0_i32_0 = arith.constant 0 : i32
    %c0_i32_1 = arith.constant 0 : i32
    return %arg0, %c0_i32, %c0_i32_0 : i32, i32, i32
  }
  func.func @transform_2(%arg0: i32, %arg1: i32) -> (i32, i32, i32) {
    %c0_i32 = arith.constant 0 : i32
    %c0_i32_0 = arith.constant 0 : i32
    %c0_i32_1 = arith.constant 0 : i32
    return %arg0, %c0_i32, %c0_i32_0 : i32, i32, i32
  }
  func.func @transform_3(%arg0: i32, %arg1: i32) -> (i32, i32, i32) {
    %c0_i32 = arith.constant 0 : i32
    %c0_i32_0 = arith.constant 0 : i32
    return %arg0, %arg1, %c0_i32 : i32, i32, i32
  }
  func.func @transform_4(%arg0: i32, %arg1: i32) -> (i32, i32, i32) {
    %c0_i32 = arith.constant 0 : i32
    %c0_i32_0 = arith.constant 0 : i32
    return %arg0, %arg1, %c0_i32 : i32, i32, i32
  }
}

</mosaic_0001>

<bundles_post_ra>
// kernel: tpu_custom_call.1
= control target key start
LH: loop header
LB: loop body
LE: loop exit
PB: predicated region body
PF: predicated region fallthrough
CT: control target
= control target key end

     0   :  { %s1355_s0 = inlined_call_operand.hbm [shape: f32[2,8,128], index: 0, kind: input, shape index: {}]   ;;  %s1356_s1 = inlined_call_operand.hbm [shape: f32[2,8,128], index: 1, kind: input, shape index: {}]   ;;  %s1357_s2 = inlined_call_operand.hbm [shape: f32[2,8,128], index: 2, kind: input, shape index: {}]   ;;  %s1358_s3 = inlined_call_operand.hbm [shape: f32[2,8,128], index: 3, kind: output, shape index: {0}]   ;;  %s1359_s4 = inlined_call_operand.hbm [shape: f32[2,8,8], index: 4, kind: output, shape index: {1}]  }
   0x1   :  { %1363 = sst [smem:[#allocation19_spill]] %s1356_s1 }
   0x2   :  { %10 = vsyncpa [#allocation3], 0 }
   0x3   :  { %12 = vsyncpa [#allocation3 + $0x1], 0 }
   0x4   :  { %13 = vsyncpa [#allocation6], 0 }
   0x5   :  { %15 = vsyncpa [#allocation6 + $0x1], 0 }
   0x6   :  { %16 = vsyncpa [#allocation4], 0 }
   0x7   :  { %18 = vsyncpa [#allocation4 + $0x1], 0 }
   0x8   :  { %19 = vsyncpa [#allocation10], 0 }
   0x9   :  { %21 = vsyncpa [#allocation10 + $0x1], 0  ;;  %s1178_s15 = smov 0   ;;  %s1180_s16 = smov 0  }
   0xa   :  { %s1182_s17 = smov 0   ;;  %s1184_s18 = smov 0  }
   0xb   :  { %s1186_s19 = smov 0   ;;  %s1188_s20 = smov 0  }
   0xc LB: > { %1364 = sst [smem:[#allocation15_spill]] %s1139_s17  ;;  %s1209_s21 = sadd.s32 4294967295, %s1151_s20   ;;  %s1151_s20 = sphi %s1188_s20, %s27_s20   ;;  %s1147_s19 = sphi %s1186_s19, %s1378_s19   ;;  %s1143_s18 = sphi %s1184_s18, %s1377_s18   ;;  %s1139_s17 = sphi %s1182_s17, %s1376_s17   ;;  %s1135_s16 = sphi %s1180_s16, %s1380_s16   ;;  %s1131_s15 = sphi %s1178_s15, %s1379_s15  }
   0xd   : > { %1365 = sst [smem:[#allocation16_spill]] %s1147_s19  ;;  %s841_s22 = sadd.s32 4294967294, %s1151_s20  }
   0xe   : > { %s39_s23 = sadd.s32 1, %s1147_s19  ;;  %s48_s24 = sadd.s32 1, %s1139_s17 }
   0xf   : > { %p41_p0 = scmp.ge.s32.totalorder %s39_s23, 2  ;;  %p55_p1 = scmp.ne.s32.totalorder %s1139_s17, %s1135_s16 }
  0x10   : > { %p56_p2 = scmp.eq.s32.totalorder %s1151_s20, 0  ;;  %p61_p3 = scmp.ne.s32.totalorder %s1135_s16, %s1131_s15 }
  0x11   : > { %s1382_s23 = smov (%p41_p0, %s39_s23), 0  ;;  %p62_p5 = scmp.eq.s32.totalorder %s1209_s21, 0 }
  0x12   : > { %1366 = sst [smem:[#allocation17_spill]] %s1382_s23  ;;  %p1221_p4 = por %p56_p2, %p55_p1 }
  0x13   : > { %s43_s26 = ssub.s32 %s1147_s19, %s1382_s23  ;;  %p139_p6 = scmp.eq.s32.totalorder %s1209_s21, 1 }
  0x14   : > { %p46_p7 = scmp.eq.s32.totalorder %s43_s26, 0  ;;  %p1229_p8 = por %p62_p5, %p61_p3 }
  0x15   : > { %p1233_p9 = por %p139_p6, %p55_p1  ;;  %p145_p10 = scmp.eq.s32.totalorder %s841_s22, 1 }
  0x16   : > { %s1238_s29 = scalar_select %p46_p7, %s1139_s17, %s48_s24  }
  0x17   : > { %p1240_p11 = por %p145_p10, %p61_p3  ;;  %p843_p12 = scmp.ge.s32.totalorder %s1151_s20, 2 }
  0x18   : > { %1370 = sst [smem:[#allocation18_spill]] %s1238_s29  ;;  %p889_p13 = scmp.lt.s32.totalorder %s1151_s20, 2 }
  0x19   : > { %s193_s5 = sand.u32 1, %s1139_s17   ;;  %s845_s7 = sshll.u32 %s1147_s19, 3 }
  0x1a   : > { %s844_s6 = sshll.u32 %s193_s5, 3  ;;  %p1250_p0 = pnand %p889_p13, %p1221_p4 }
  0x1b   : > { %s213_s9 = sand.u32 1, %s1151_s20   ;;  %s1373_s1 = sld [smem:[#allocation19_spill]] }
  0x1c   : > { %s217_s14 = scalar_lea.vmem [#allocation5], %s844_s6  ;;  %s214_s24 = scalar_lea.sflag [#allocation6], %s213_s9 }
  0x1d   : > { %s225_s22 = sshll.u32 %s217_s14, 4  ;;  %p850_p1 = scmp.ge.s32.totalorder %s1151_s20, 1  ;;  %s226_s22 = int_to_ptr.vmem [resolvable:$true] %s225_s22 }
  0x1e   : > { %p249_p2 = scmp.lt.s32.totalorder %s1151_s20, 3  ;;  %s202_s10 = scalar_lea.hbm %s1355_s0, %s845_s7 }
  0x1f   : > { %s204_s11 = sshll.u32 %s202_s10, 4  ;;  %s194_s14 = scalar_lea.sflag [#allocation3], %s193_s5  ;;  %s205_s11 = int_to_ptr.hbm [resolvable:$true] %s204_s11 }
  0x20   : > { %p1262_p3 = pnand %p850_p1, %p249_p2  ;;  %s236_s29 = scalar_lea.vmem [#allocation7], %s844_s6 }
  0x21   : > { %s221_s12 = scalar_lea.hbm %s1373_s1, %s845_s7  ;;  %s244_s17 = sshll.u32 %s236_s29, 4  ;;  %s245_s17 = int_to_ptr.vmem [resolvable:$true] %s244_s17 }
  0x22   : > { %s223_s13 = sshll.u32 %s221_s12, 4  ;;  %s197_s12 = scalar_lea.vmem [#allocation2], %s844_s6  ;;  %s224_s13 = int_to_ptr.hbm [resolvable:$true] %s223_s13 }
  0x23   : > { %878 = dma.hbm_to_vmem [thread:$0]  (!%p1250_p0), %s224_s13, 128, %s226_s22, %s214_s24  }
  0x24   : > { %s206_s1 = sshll.u32 %s197_s12, 4  ;;  %s240_s22 = scalar_lea.hbm %s1357_s2, %s845_s7  ;;  %s207_s1 = int_to_ptr.vmem [resolvable:$true] %s206_s1 }
  0x25   : > { %875 = dma.hbm_to_vmem [thread:$0]  (!%p1250_p0), %s205_s11, 128, %s207_s1, %s194_s14  }
  0x26   : > { %s242_s19 = sshll.u32 %s240_s22, 4  ;;  %253 = sbr.rel (%p1262_p3) target bundleno = 620 (0x26c), region = 32  ;;  %s243_s19 = int_to_ptr.hbm [resolvable:$true] %s242_s19 }
  0x27   : > { %881 = dma.hbm_to_vmem [thread:$0]  (!%p1250_p0), %s243_s19, 128, %s245_s17, %s214_s24  }
  0x28   : > { %s1279_s23 = sand.u32 (!%p1262_p3), 1, %s1135_s16  }
  0x29   : > { %s1282_s1 = sshll.u32 (!%p1262_p3), %s1279_s23, 3  ;;  %s256_s5 = scalar_lea.sflag (!%p1262_p3), [#allocation3], %s1279_s23 }
  0x2a   : > { %s259_s7 = scalar_lea.vmem (!%p1262_p3), [#allocation2], %s1282_s1 }
  0x2b   : > { %1114 = dma.done.wait (%p1229_p8), %s256_s5, 128  }
  0x2c   : > { %1116 = vsyncadd (%p1229_p8), %s256_s5, 4294967168  ;;  %s265_s17 = sand.u32 1, %s1209_s21   ;;  %s269_s29 = scalar_lea.vmem [#allocation5], %s1282_s1 }
  0x2d   : > { %s266_s19 = scalar_lea.sflag [#allocation6], %s265_s17 }
  0x2e   : > { %1118 = dma.done.wait (%p1229_p8), %s266_s19, 256  }
  0x2f   : > { %1120 = vsyncadd (%p1229_p8), %s266_s19, 4294967040  ;;  %v322_v0 = vld [vmem:[%s269_s29] sm:$0xff]  ;;  %v320_v1 = vld [vmem:[%s259_s7] sm:$0xff]  ;;  %vm469_vm0 = vcmask 64512   ;;  %s279_s21 = scalar_lea.vmem [#allocation7], %s1282_s1  ;;  %s319_s27 = scalar_lea.vmem [#allocation9], %s1282_s1 }
  0x30   : > { %v338_v2 = vand.u32 4294901760, %v322_v0  ;;  %v321_v3 = vmul.f32 0.17677669, %v320_v1  ;;  %v494_v30 = vld [vmem:[%s279_s21] sm:$0xff]  ;;  %s858_s6 = sshll.u32 %s1143_s18, 3  ;;  %s680_s26 = sshll.u32 %s319_s27, 4  ;;  %s681_s26 = int_to_ptr.vmem [resolvable:$true] %s680_s26 }
  0x31   : > { %v513_v31 = vand.u32 4294901760, %v494_v30  ;;  %s678_s25 = scalar_lea.hbm %s1359_s4, %s858_s6  ;;  %s652_s11 = scalar_lea.sflag [#allocation10], %s1279_s23 }
  0x32   : > { %v365_v4 = vsub.f32 %v322_v0, %v338_v2  ;;  %415 = vmatpush.xpose.msra.mxu3 %v338_v2  ;;  %339 = vmatpush.xpose.msra.mxu0 %v338_v2  ;;  %v340_v5 = vand.u32 4294901760, %v321_v3  ;;  %s682_s10 = sshll.u32 %s678_s25, 4  ;;  %s1053_s18 = scalar_lea.hbm %s1359_s4, 16  ;;  %s683_s10 = int_to_ptr.hbm [resolvable:$true] %s682_s10 }
  0x33   : > { %v540_v32 = vsub.f32 %v494_v30, %v513_v31  ;;  %s1047_s12 = sshra.s32 %s683_s10, 4  ;;  %s1048_s12 = int_to_ptr.hbm [resolvable:$true] %s1047_s12 }
  0x34   : > { %392 = vmatpush.xpose.msra.mxu2 %v365_v4  ;;  %v341_v6 = vsub.f32 %v321_v3, %v340_v5  ;;  %v366_v7 = vand.u32 4294901760, %v365_v4  ;;  %s1049_s14 = scalar_lea.hbm %s1048_s12, 8  ;;  %p1054_p7 = scmp.lt.s32.totalorder %s1048_s12, %s1359_s4 }
  0x35   : > { %v541_v33 = vand.u32 4294901760, %v540_v32  ;;  %p1050_p4 = scmp.ne.s32.totalorder %s1048_s12, %s1049_s14  ;;  %p1055_p8 = scmp.lt.s32.totalorder %s1053_s18, %s1049_s14 }
  0x36   : > { %v367_v8 = vsub.f32 %v365_v4, %v366_v7  ;;  %v342_v9 = vand.u32 4294901760, %v341_v6  ;;  %441 = vmatpush.xpose.msrb.mxu0 %v366_v7 }
  0x37   : > { %395 = vmatmul.f32.vlgmr.msra.gmra.mxu2 %v341_v6  ;;  %v542_v34 = vsub.f32 %v540_v32, %v541_v33  ;;  %p1051_p5 = pnand %p1050_p4, %p1233_p9  ;;  %p1056_p10 = por %p1055_p8, %p1054_p7 }
  0x38   : > { %v368_v10 = vand.u32 4294901760, %v367_v8  ;;  %419 = vmatmul.f32.vlgmr.msra.gmra.mxu3 %v342_v9  ;;  %v343_v11 = vsub.f32 %v341_v6, %v342_v9  ;;  %514 = vmatpush.msrb.mxu2 %v513_v31 }
  0x39   : > { %v543_v35 = vand.u32 4294901760, %v542_v34  ;;  %p1052_p6 = pneg %p1051_p5 }
  0x3a   : > { %369 = vmatpush.xpose.msra.mxu1 %v368_v10  ;;  %v344_v12 = vand.u32 4294901760, %v343_v11  ;;  %616 = vmatpush.msra.mxu2 %v541_v33 }
  0x3b   : > { %544 = vmatpush.msrb.mxu3 %v543_v35  ;;  %p1057_p13 = pnand %p1056_p10, %p1052_p6 }
  0x3c   : > { %345 = vmatmul.f32.vlgmr.msra.gmra.mxu0 %v344_v12 }
  0x3d   : > { %371 = vmatmul.f32.vlgmr.msra.gmra.mxu1 %v340_v5  ;;  %567 = vmatpush.msra.mxu0 %v540_v32 }
  0x3e   : > { %463 = vmatpush.xpose.msrb.mxu1 %v338_v2  ;;  %638 = vmatpush.msra.mxu3 %v513_v31 }
  0x42   : > { %590 = vmatpush.msra.mxu1 %v513_v31 }
  0x44   : > { %443 = vmatmul.f32.vlgmr.msrb.gmra.mxu0 %v340_v5 }
  0x45   : > { %465 = vmatmul.f32.vlgmr.msrb.gmra.mxu1 %v340_v5 }
  0xb9   : > { %v346_v13 = vpop.f32.mrf.mxu0 }
  0xba   : > { %v372_v14 = vpop.f32.mrf.mxu1  ;;  %v396_v15 = vpop.f32.mrf.mxu2 }
  0xbb   : > { %v373_v16 = vadd.f32 %v372_v14, %v346_v13  ;;  %v420_v17 = vpop.f32.mrf.mxu3 }
  0xbd   : > { %v397_v18 = vadd.f32 %v396_v15, %v373_v16 }
  0xbf   : > { %v421_v19 = vadd.f32 %v420_v17, %v397_v18 }
  0xc1   : > { %v444_v20 = vpop.f32.mrf.mxu0 }
  0xc2   : > { %v445_v21 = vadd.f32 %v444_v20, %v421_v19  ;;  %v466_v22 = vpop.f32.mrf.mxu1 }
  0xc4   : > { %v467_v23 = vadd.f32 %v466_v22, %v445_v21 }
  0xc6   : > { %v470_v24 = vsel %vm469_vm0, %v467_v23, -inf }
  0xc7   : > { %471 = vmax.xlane.f32.xlu0 %v470_v24 }
 0x13a   : > { %v472_v25 = vpop.xlane.xlu0 %471 }
 0x13b   : > { %v473_v26 = vsub.f32 %v467_v23, %v472_v25 }
 0x13d   : > { %v474_v27 = vmul.f32 1.442695, %v473_v26 }
 0x13f   : > { %939 = vpow2.f32 %v474_v27 }
 0x145   : > { %v940_v28 = vpop.eup %939 }
 0x146   : > { %v476_v29 = vsel %vm469_vm0, %v940_v28, 0.0 }
 0x147   : > { %477 = vadd.xlane.f32.xlu0 %v476_v29 }
 0x1ba   : > { %v478_v36 = vpop.xlane.xlu0 %477 }
 0x1bb   : > { %941 = vrcp.f32 %v478_v36  ;;  %v490_v40 = vand.u32 2147483648, %v478_v36  ;;  %v488_v42 = vand.u32 2147483647, %v478_v36  ;;  %vm484_vm2 = vweird.f32 %v478_v36 }
 0x1bd   : > { %v491_v44 = vor.u32 1.1754944e-38, %v490_v40  ;;  %vm489_vm4 = vcmp.eq.f32.partialorder %v488_v42, 8.507059e+37 }
 0x1c1   : > { %v942_v37 = vpop.eup %941 }
 0x1c2   : > { %v480_v38 = vmul.f32 %v942_v37, %v478_v36  ;;  %vm485_vm1 = vweird.f32 %v942_v37 }
 0x1c3   : > { %vm486_vm3 = vmor %vm484_vm2, %vm485_vm1 }
 0x1c4   : > { %v481_v39 = vsub.f32 1.0, %v480_v38 }
 0x1c6   : > { %v482_v41 = vmul.f32 %v942_v37, %v481_v39 }
 0x1c8   : > { %v483_v43 = vadd.f32 %v942_v37, %v482_v41 }
 0x1ca   : > { %v487_v45 = vsel %vm486_vm3, %v942_v37, %v483_v43 }
 0x1cb   : > { %v492_v46 = vsel %vm489_vm4, %v491_v44, %v487_v45 }
 0x1cc   : > { %v493_v47 = vmul.f32 %v940_v28, %v492_v46 }
 0x1ce   : > { %v496_v48 = vsel %vm469_vm0, %v493_v47, 0  ;;  %645 = vst.msk [vmem:[%s319_s27] sm:$0xff] %vm469_vm0, %v493_v47 }
 0x1cf   : > { %v515_v49 = vand.u32 4294901760, %v496_v48 }
 0x1d1   : > { %546 = vmatmul.f32.vlgmr.msrb.gmra.mxu3 %v515_v49  ;;  %v516_v50 = vsub.f32 %v496_v48, %v515_v49 }
 0x1d3   : > { %570 = vmatmul.f32.vlgmr.msra.gmra.mxu0 %v516_v50  ;;  %v517_v51 = vand.u32 4294901760, %v516_v50 }
 0x1d5   : > { %594 = vmatmul.f32.vlgmr.msra.gmra.mxu1 %v517_v51  ;;  %v518_v52 = vsub.f32 %v516_v50, %v517_v51 }
 0x1d7   : > { %v519_v53 = vand.u32 4294901760, %v518_v52 }
 0x1d9   : > { %520 = vmatmul.f32.vlgmr.msrb.gmra.mxu2 %v519_v53  ;;  %640 = vmatmul.f32.vlgmr.msra.gmra.mxu3 %v515_v49 }
 0x1e1   : > { %618 = vmatmul.f32.vlgmr.msra.gmra.mxu2 %v515_v49 }
 0x1e2   : > { %1060 = shalt.err (!%p1057_p13)
}
 0x1e3   : > { %869 = dma.vmem_to_hbm [thread:$0]  (%p1233_p9), %s681_s26, 128, %s683_s10, %s652_s11  }
 0x1e4   : > { %s663_s19 = scalar_lea.hbm %s1358_s3, %s858_s6  ;;  %s312_s29 = scalar_lea.vmem [#allocation8], %s1282_s1 }
 0x1e5   : > { %s665_s21 = sshll.u32 %s312_s29, 4  ;;  %s667_s27 = sshll.u32 %s663_s19, 4  ;;  %s666_s21 = int_to_ptr.vmem [resolvable:$true] %s665_s21  ;;  %s668_s27 = int_to_ptr.hbm [resolvable:$true] %s667_s27 }
 0x1e6   : > { %s647_s8 = scalar_lea.sflag [#allocation4], %s1279_s23  ;;  %s1075_s24 = sshra.s32 %s668_s27, 4  ;;  %s1076_s24 = int_to_ptr.hbm [resolvable:$true] %s1075_s24 }
 0x1e7   : > { %s1077_s25 = scalar_lea.hbm %s1076_s24, 8  ;;  %s1081_s1 = scalar_lea.hbm %s1358_s3, 16 }
 0x1e8   : > { %p1078_p0 = scmp.ne.s32.totalorder %s1076_s24, %s1077_s25  ;;  %p1082_p3 = scmp.lt.s32.totalorder %s1076_s24, %s1358_s3 }
 0x1e9   : > { %p1083_p4 = scmp.lt.s32.totalorder %s1081_s1, %s1077_s25 }
 0x1ea   : > { %p1079_p1 = pnand %p1078_p0, %p1233_p9 }
 0x1eb   : > { %p1084_p5 = por %p1083_p4, %p1082_p3 }
 0x1ec   : > { %p1080_p2 = pneg %p1079_p1 }
 0x1ee   : > { %p1085_p6 = pnand %p1084_p5, %p1080_p2 }
 0x250   : > { %v571_v57 = vpop.f32.mrf.mxu0 }
 0x252   : > { %v595_v59 = vpop.f32.mrf.mxu1 }
 0x254   : > { %v547_v54 = vpop.f32.mrf.mxu3 }
 0x25c   : > { %v521_v55 = vpop.f32.mrf.mxu2  ;;  %v641_v63 = vpop.f32.mrf.mxu3 }
 0x25d   : > { %v548_v56 = vadd.f32 %v547_v54, %v521_v55 }
 0x25f   : > { %v572_v58 = vadd.f32 %v571_v57, %v548_v56 }
 0x261   : > { %v596_v60 = vadd.f32 %v595_v59, %v572_v58 }
 0x264   : > { %v619_v61 = vpop.f32.mrf.mxu2 }
 0x265   : > { %v620_v62 = vadd.f32 %v619_v61, %v596_v60 }
 0x267   : > { %v642_v0 = vadd.f32 %v641_v63, %v620_v62 }
 0x269   : > { %644 = vst [vmem:[%s312_s29] sm:$0xff] %v642_v0 }
 0x26a   : > { %1088 = shalt.err (!%p1085_p6)
}
 0x26b   : > { %868 = dma.vmem_to_hbm [thread:$0]  (%p1233_p9), %s666_s21, 128, %s668_s27, %s647_s8  }
 0x26c PF: > { %s694_s23 = sand.u32 1, %s1131_s15   ;;  %p883_p7 = pnand %p843_p12, %p1240_p11 }
 0x26d   : > { %s695_s12 = scalar_lea.sflag [#allocation4], %s694_s23 }
 0x26e   : > { %p884_p8 = pneg %p883_p7 }
 0x270   : > { %1122 = dma.done.wait (%p884_p8), %s695_s12, 128  }
 0x271   : > { %1124 = vsyncadd (%p884_p8), %s695_s12, 4294967168  ;;  %s705_s14 = scalar_lea.sflag [#allocation10], %s694_s23 }
 0x272   : > { %1126 = dma.done.wait (%p884_p8), %s705_s14, 128  }
 0x273   : > { %1128 = vsyncadd (%p884_p8), %s705_s14, 4294967168  ;;  %s27_s20 = sadd.s32 1, %s1151_s20   ;;  %s1375_s28 = sld [smem:[#allocation15_spill]] }
 0x274   : > { %p24_p10 = scmp.ge.s32.totalorder %s27_s20, 4   ;;  %s1376_s17 = sld [smem:[#allocation18_spill]] }
 0x275   : > { %s1377_s18 = sld [smem:[#allocation16_spill]]  ;;  %s1379_s15 = smov %s1135_s16 }
 0x276   : > { %s1378_s19 = sld [smem:[#allocation17_spill]]  ;;  %26 = sbr.rel (!%p24_p10) target bundleno = 12 (0xc), region = 118 }
 0x279   : > { %s1380_s16 = smov %s1375_s28 }
 0x27b   :  { %711 = vsyncpa [#allocation3], 1 }
 0x27c   :  { %713 = vsyncpa [#allocation3 + $0x1], 1 }
 0x27d   :  { %714 = vsyncpa [#allocation6], 1 }
 0x27e   :  { %716 = vsyncpa [#allocation6 + $0x1], 1 }
 0x27f   :  { %717 = vsyncpa [#allocation4], 1 }
 0x280   :  { %719 = vsyncpa [#allocation4 + $0x1], 1 }
 0x281   :  { %720 = vsyncpa [#allocation10], 1 }
 0x282   :  { %722 = vsyncpa [#allocation10 + $0x1], 1 }

</bundles_post_ra>
